<compile_context>
chip_gen: v5e
topology: v5e:2x2
jax: 0.10.0
libtpu: 0.0.40
codegen_flags: <defaults>
</compile_context>

<pallas_src>
import jax
import jax.numpy as jnp
from jax.experimental import pallas as pl
from jax.experimental.pallas import tpu as pltpu


def mlp_kernel(x_ref, w1_ref, b1_ref, w2_ref, b2_ref, o_ref):
    # linear1: [N, D_in] @ [D_in, H] + [1, H], then clamp(min=0) == ReLU
    h = jnp.dot(x_ref[...], w1_ref[...], preferred_element_type=jnp.float32)
    h = jnp.maximum(h + b1_ref[...], 0.0)
    # linear2: [N, H] @ [H, D_out] + [1, D_out]
    y = jnp.dot(h, w2_ref[...], preferred_element_type=jnp.float32)
    o_ref[...] = (y + b2_ref[...]).astype(o_ref.dtype)


def mlp_forward(x, w1, b1, w2, b2):
    N, D_in = x.shape
    H = w1.shape[1]
    D_out = w2.shape[1]

    flops = 2 * N * (D_in * H + H * D_out)
    bytes_accessed = (
        sum(int(a.size) * a.dtype.itemsize for a in (x, w1, b1, w2, b2))
        + N * D_out * x.dtype.itemsize
    )

    vmem_spec = pl.BlockSpec(memory_space=pltpu.MemorySpace.VMEM)
    return pl.pallas_call(
        mlp_kernel,
        out_shape=jax.ShapeDtypeStruct((N, D_out), x.dtype),
        in_specs=[vmem_spec] * 5,
        out_specs=vmem_spec,
        cost_estimate=pl.CostEstimate(
            flops=flops, transcendentals=0, bytes_accessed=bytes_accessed
        ),
    )(x, w1, b1, w2, b2)


mlp_forward_jit = jax.jit(mlp_forward)


if __name__ == "__main__":
    # Shapes implied by the module: x [N, D_in], linear1: D_in->H, linear2: H->D_out
    N, D_in, H, D_out = 8, 32, 64, 16

    key = jax.random.PRNGKey(0)
    kx, kw1, kb1, kw2, kb2 = jax.random.split(key, 5)

    x = jax.random.normal(kx, (N, D_in), dtype=jnp.float32)
    # Deterministic "PyTorch-style" init (uniform in +/- 1/sqrt(fan_in)),
    # stored transposed as [in, out] for the kernel.
    lim1 = 1.0 / jnp.sqrt(D_in)
    lim2 = 1.0 / jnp.sqrt(H)
    w1 = jax.random.uniform(kw1, (D_in, H), jnp.float32, -lim1, lim1)
    b1 = jax.random.uniform(kb1, (1, H), jnp.float32, -lim1, lim1)
    w2 = jax.random.uniform(kw2, (H, D_out), jnp.float32, -lim2, lim2)
    b2 = jax.random.uniform(kb2, (1, D_out), jnp.float32, -lim2, lim2)

    y = mlp_forward_jit(x, w1, b1, w2, b2)
    jax.block_until_ready(y)

    # Reference check in plain JAX
    y_ref = jnp.maximum(x @ w1 + b1, 0.0) @ w2 + b2
    assert y.shape == (N, D_out)
    assert jnp.allclose(y, y_ref, atol=1e-5, rtol=1e-5)

    print("KERNEL_OK")
</pallas_src>

<mosaic_0001>
module attributes {stable_mosaic.version = 11 : i64} {
  func.func @mlp_kernel(%arg0: memref<8x32xf32, #tpu.memory_space<vmem>>, %arg1: memref<32x64xf32, #tpu.memory_space<vmem>>, %arg2: memref<1x64xf32, #tpu.memory_space<vmem>>, %arg3: memref<64x16xf32, #tpu.memory_space<vmem>>, %arg4: memref<1x16xf32, #tpu.memory_space<vmem>>, %arg5: memref<8x16xf32, #tpu.memory_space<vmem>>) attributes {dimension_semantics = [], scalar_prefetch = 0 : i64, scratch_operands = 0 : i64, tpu.core_type = #tpu.core_type<tc>} {
    %c0 = arith.constant 0 : index
    %c0_0 = arith.constant 0 : index
    %0 = vector.load %arg0[%c0, %c0_0] : memref<8x32xf32, #tpu.memory_space<vmem>>, vector<8x32xf32>
    %c0_1 = arith.constant 0 : index
    %c0_2 = arith.constant 0 : index
    %1 = vector.load %arg1[%c0_1, %c0_2] : memref<32x64xf32, #tpu.memory_space<vmem>>, vector<32x64xf32>
    %cst = arith.constant dense<0.000000e+00> : vector<8x64xf32>
    %2 = tpu.matmul %0, %1, %cst {dimension_numbers = #tpu.dot_dimension_numbers<[1], [0], [0], [1], [0, 0, 1, 1], [], []>} : vector<8x32xf32>, vector<32x64xf32>, vector<8x64xf32> -> vector<8x64xf32>
    %c0_3 = arith.constant 0 : index
    %c0_4 = arith.constant 0 : index
    %3 = vector.load %arg2[%c0_3, %c0_4] : memref<1x64xf32, #tpu.memory_space<vmem>>, vector<1x64xf32>
    %4 = vector.broadcast %3 : vector<1x64xf32> to vector<8x64xf32>
    %5 = arith.addf %2, %4 : vector<8x64xf32>
    %cst_5 = arith.constant 0.000000e+00 : f32
    %6 = vector.broadcast %cst_5 : f32 to vector<8x64xf32>
    %7 = arith.maximumf %5, %6 : vector<8x64xf32>
    %c0_6 = arith.constant 0 : index
    %c0_7 = arith.constant 0 : index
    %8 = vector.load %arg3[%c0_6, %c0_7] : memref<64x16xf32, #tpu.memory_space<vmem>>, vector<64x16xf32>
    %cst_8 = arith.constant dense<0.000000e+00> : vector<8x16xf32>
    %9 = tpu.matmul %7, %8, %cst_8 {dimension_numbers = #tpu.dot_dimension_numbers<[1], [0], [0], [1], [0, 0, 1, 1], [], []>} : vector<8x64xf32>, vector<64x16xf32>, vector<8x16xf32> -> vector<8x16xf32>
    %c0_9 = arith.constant 0 : index
    %c0_10 = arith.constant 0 : index
    %10 = vector.load %arg4[%c0_9, %c0_10] : memref<1x16xf32, #tpu.memory_space<vmem>>, vector<1x16xf32>
    %11 = vector.broadcast %10 : vector<1x16xf32> to vector<8x16xf32>
    %12 = arith.addf %9, %11 : vector<8x16xf32>
    %c0_11 = arith.constant 0 : index
    %c0_12 = arith.constant 0 : index
    %13 = vector.load %arg5[%c0_11, %c0_12] : memref<8x16xf32, #tpu.memory_space<vmem>>, vector<8x16xf32>
    tpu.vector_store %arg5[%c0_11, %c0_12], %12 {strides = array<i32>} : memref<8x16xf32, #tpu.memory_space<vmem>>, vector<8x16xf32>,
    return
  }
}

</mosaic_0001>

<bundles_post_ra>
// kernel: mlp_forward.1
= control target key start
LH: loop header
LB: loop body
LE: loop exit
PB: predicated region body
PF: predicated region fallthrough
CT: control target
= control target key end

     0   :  { %s219_s0 = inlined_call_operand.vmem [shape: f32[8,32], index: 0, kind: input, shape index: {}]   ;;  %s220_s1 = inlined_call_operand.vmem [shape: f32[32,64], index: 1, kind: input, shape index: {}]   ;;  %s221_s2 = inlined_call_operand.vmem [shape: f32[1,64], index: 2, kind: input, shape index: {}]   ;;  %s222_s3 = inlined_call_operand.vmem [shape: f32[64,16], index: 3, kind: input, shape index: {}]   ;;  %s223_s4 = inlined_call_operand.vmem [shape: f32[1,16], index: 4, kind: input, shape index: {}]   ;;  %s224_s5 = inlined_call_operand.hbm [shape: f32[8,16], index: 5, kind: output, shape index: {}]  }
   0x1   :  { %v25_v0 = vld [vmem:[%s220_s1 + $0x18] sm:$0xff]  ;;  %v24_v1 = vld [vmem:[%s220_s1 + $0x10] sm:$0xff]  ;;  %v23_v3 = vld [vmem:[%s220_s1 + $0x8] sm:$0xff] }
   0x2   :  { %46 = vmatpush.msra.mxu0 %v25_v0  ;;  %v62_v2 = vld [vmem:[%s222_s3 + $0x38] sm:$0xff]  ;;  %v61_v4 = vld [vmem:[%s222_s3 + $0x30] sm:$0xff]  ;;  %v60_v5 = vld [vmem:[%s222_s3 + $0x28] sm:$0xff] }
   0x3   :  { %79 = vmatpush.msra.mxu1 %v62_v2  ;;  %v22_v6 = vld [vmem:[%s220_s1] sm:$0xff] }
   0x4   :  { %47 = vmatpush.msra.mxu0 %v24_v1 }
   0x5   :  { %80 = vmatpush.msra.mxu1 %v61_v4 }
   0x6   :  { %10 = vsyncpa [#allocation3], 0  ;;  %48 = vmatpush.msra.mxu0 %v23_v3  ;;  %v21_v7 = vld [vmem:[%s219_s0] sm:$0xff]  ;;  %vm30_vm0 = vcmask 261120   ;;  %v58_v9 = vld [vmem:[%s222_s3 + $0x18] sm:$0xff]  ;;  %vm67_vm1 = vcmask 523264  }
   0x7   :  { %v59_v8 = vld [vmem:[%s222_s3 + $0x20] sm:$0xff]  ;;  %81 = vmatpush.msra.mxu1 %v60_v5  ;;  %v57_v10 = vld [vmem:[%s222_s3 + $0x10] sm:$0xff]  ;;  %v56_v11 = vld [vmem:[%s222_s3 + $0x8] sm:$0xff]  ;;  %s140_s21 = smov [#allocation2]   ;;  %vm91_vm2 = vcmask 130048  }
   0x8   :  { %49 = vmatpush.msra.mxu0 %v22_v6  ;;  %v55_v12 = vld [vmem:[%s222_s3] sm:$0xff]  ;;  %s98_s22 = sshll.u32 %s140_s21, 4  ;;  %s100_s3 = sshll.u32 %s224_s5, 4  ;;  %s99_s22 = int_to_ptr.vmem [resolvable:$true] %s98_s22  ;;  %s101_s3 = int_to_ptr.hbm [resolvable:$true] %s100_s3 }
   0x9   :  { %109 = vmatmul.msk.f32.vlgmr.msra.gmra.mxu0 %vm30_vm0, %v21_v7  ;;  %82 = vmatpush.msra.mxu1 %v59_v8  ;;  %v112_v13 = vld [vmem:[%s221_s2] ss:$0 sm:$0xff] }
   0xa   :  { %v113_v17 = vld [vmem:[%s223_s4] ss:$0 sm:$0xff] }
   0xb   :  { %83 = vmatpush.msra.mxu1 %v58_v9 }
   0xd   :  { %84 = vmatpush.msra.mxu1 %v57_v10 }
   0xf   :  { %85 = vmatpush.msra.mxu1 %v56_v11 }
  0x11   :  { %86 = vmatpush.msra.mxu1 %v55_v12 }
  0x86   :  { %v51_v14 = vpop.f32.mrf.mxu0 }
  0x87   :  { %v52_v15 = vadd.f32 %v112_v13, %v51_v14 }
  0x89   :  { %v54_v16 = vmax.f32 %v52_v15, 0.0 }
  0x8b   :  { %110 = vmatmul.msk.f32.vlgmr.msra.gmra.mxu1 %vm67_vm1, %v54_v16 }
 0x108   :  { %v88_v18 = vpop.f32.mrf.mxu1 }
 0x109   :  { %v89_v19 = vadd.f32 %v113_v17, %v88_v18 }
 0x10b   :  { %92 = vst.msk [vmem:[#allocation2] sm:$0xff] %vm91_vm2, %v89_v19 }
 0x10c   :  { %103 = dma.vmem_to_hbm [thread:$0]  %s99_s22, 128, %s101_s3, [#allocation3]  }
 0x10d   :  { %138 = dma.done.wait [#allocation3], 128  }
 0x10e   :  { %139 = vsyncadd [#allocation3], 4294967168 }
 0x10f   :  { %108 = vsyncpa [#allocation3], 1 }

</bundles_post_ra>
